<compile_context>
chip_gen: v6e
topology: v6e:2x2x1
jax: 0.10.0
libtpu: 0.0.40
codegen_flags: <defaults>
</compile_context>

<pallas_src>
import functools

import jax
import jax.numpy as jnp
from jax.experimental import pallas as pl
from jax.experimental.pallas import tpu as pltpu


def _round_up(x, m):
    return (x + m - 1) // m * m


def _cdiv(a, b):
    return (a + b - 1) // b


def _vmem_capacity_bytes():
    """Physical VMEM per core (128 MiB v5e/v6e, 64 MiB v7x); safe fallback."""
    try:
        info = pltpu.get_tpu_info()
        cap = int(getattr(info, "vmem_capacity_bytes", 0))
        if cap > 0:
            return cap
    except Exception:
        pass
    return 128 * 1024 * 1024


@functools.lru_cache(maxsize=None)
def _buffered_one_supported():
    """Probe whether pipeline_mode=pl.Buffered(1) (single-buffered resident
    parameters) lowers and runs on this JAX / libtpu build."""
    if not hasattr(pl, "Buffered"):
        return False
    try:
        def _probe(x_ref, o_ref):
            o_ref[...] = x_ref[...] + 1.0

        f = pl.pallas_call(
            _probe,
            out_shape=jax.ShapeDtypeStruct((8, 128), jnp.float32),
            grid=(2,),
            in_specs=[pl.BlockSpec((8, 128), lambda i: (0, 0),
                                   pipeline_mode=pl.Buffered(1))],
            out_specs=pl.BlockSpec((8, 128), lambda i: (0, 0)),
        )
        jax.block_until_ready(f(jnp.zeros((8, 128), jnp.float32)))
        return True
    except Exception:
        return False


def _residual_ff_kernel(x_ref, w1_ref, b1_ref, w2_ref, b2_ref, o_ref, acc_ref,
                        *, approximate_gelu):
    # x_ref: (tile_m, D) in the activation dtype; w1/w2 bf16; b1/b2 f32.
    j = pl.program_id(1)          # hidden-dim (reduction) step

    x = x_ref[...]

    # First matmul on the MXU: bf16 operands, f32 accumulation.
    h = jnp.dot(x.astype(jnp.bfloat16), w1_ref[...],
                preferred_element_type=jnp.float32)
    h = h + b1_ref[...]
    # TODO(synk): PyTorch nn.GELU() is exact-erf; default here is the tanh
    # approximation (erf lowering in Pallas TPU is not guaranteed).  Pass
    # exact_gelu=True to the wrapper for strict parity if the build supports it.
    h = jax.nn.gelu(h, approximate=approximate_gelu)

    # Partial second matmul for this hidden-dim chunk.
    y = jnp.dot(h.astype(jnp.bfloat16), w2_ref[...],
                preferred_element_type=jnp.float32)

    # Initialise the f32 accumulator with residual + output bias on the first
    # hidden step, accumulate every step, downcast once at the final store.
    @pl.when(j == 0)
    def _():
        acc_ref[...] = x.astype(jnp.float32) + b2_ref[...]

    acc_ref[...] += y

    @pl.when(j == pl.num_programs(1) - 1)
    def _():
        o_ref[...] = acc_ref[...].astype(o_ref.dtype)


def residual_feedforward(x, w1, b1, w2, b2, *, tile_rows=None, tile_hidden=None,
                         exact_gelu=False, single_buffer_params=True):
    """out = GELU(x @ w1 + b1) @ w2 + b2 + x, fused in one Pallas kernel.

    x: (B, N, D); w1: (D, H); b1: (1, H); w2: (H, D); b2: (1, D).
    Accepts f32 or bf16 activations; output dtype matches x.dtype.
    """
    B, N, D = x.shape
    H = w1.shape[1]
    M = B * N
    x_itemsize = jnp.dtype(x.dtype).itemsize

    vmem_cap = _vmem_capacity_bytes()
    small_vmem = vmem_cap < 96 * 1024 * 1024          # v7x-class (64 MiB/core)
    single_buf = bool(single_buffer_params) and _buffered_one_supported()

    # ---- row tile -----------------------------------------------------------
    if tile_rows is None:
        tile_rows = 256 if small_vmem else 512        # 512 on v5e/v6e, 256 on v7x
    tile_m = max(8, _round_up(min(tile_rows, M), 8))
    # Keep >= 2 row steps when there is enough work so both v7x TensorCores get
    # a share of the "parallel" axis (harmless on single-TC v5e/v6e).
    if M > 8 and _cdiv(M, tile_m) < 2:
        tile_m = max(8, _round_up(_cdiv(M, 2), 8))
    n_m = _cdiv(M, tile_m)
    # No host-side padding: the partial last row block is masked by Pallas
    # (OOB reads are garbage but rows are independent; OOB writes are dropped).

    # ---- hidden tile --------------------------------------------------------
    # Keep w1/w2 fully resident in VMEM when they fit in a fraction of the
    # budget, otherwise stream MXU-aligned chunks of the hidden dim with an
    # f32 accumulator (needed for ViT-L/H sized H on v7x's 64 MiB VMEM).
    param_bufs_if_resident = 1 if single_buf else 2
    weight_budget = int(0.4 * vmem_cap)
    resident_bytes = param_bufs_if_resident * 2 * 2 * D * H     # bf16 w1 + w2
    if tile_hidden is not None:
        tile_h = int(tile_hidden)
    elif resident_bytes <= weight_budget or H % 256 != 0:
        tile_h = H
    else:
        # Streamed weight chunks are double-buffered: ~4*D bf16 bytes per
        # hidden unit (w1 column + w2 row) times 2 buffers.
        chunk = weight_budget // (2 * 4 * D)
        chunk = max(256, (chunk // 256) * 256)
        # The hidden axis is a reduction: partial blocks would corrupt the
        # accumulator, so tile_h must divide H exactly.
        while H % chunk != 0:
            chunk -= 256
        tile_h = max(256, chunk)
    if H % tile_h != 0:
        tile_h = H                                   # safety: fully resident
    n_h = H // tile_h
    resident_params = (n_h == 1)

    # ---- parameter prep (once, outside the kernel) --------------------------
    w1b = w1.astype(jnp.bfloat16)
    w2b = w2.astype(jnp.bfloat16)
    b1f = b1.astype(jnp.float32).reshape(1, H)
    b2f = b2.astype(jnp.float32).reshape(1, D)
    xf = x.reshape(M, D)

    # ---- BlockSpecs ---------------------------------------------------------
    def _spec(shape, index_map, constant):
        if constant and single_buf:
            # Constant index_map -> resident block; don't double-buffer it.
            return pl.BlockSpec(shape, index_map, pipeline_mode=pl.Buffered(1))
        return pl.BlockSpec(shape, index_map)

    in_specs = [
        pl.BlockSpec((tile_m, D), lambda i, j: (i, 0)),             # x rows
        _spec((D, tile_h), lambda i, j: (0, j), resident_params),   # w1
        _spec((1, tile_h), lambda i, j: (0, j), resident_params),   # b1
        _spec((tile_h, D), lambda i, j: (j, 0), resident_params),   # w2
        _spec((1, D),      lambda i, j: (0, 0), True),              # b2
    ]
    out_spec = pl.BlockSpec((tile_m, D), lambda i, j: (i, 0))

    # ---- VMEM budget --------------------------------------------------------
    w_bufs = (1 if single_buf else 2) if resident_params else 2
    vmem_need = (
        2 * 2 * tile_m * D * x_itemsize        # x in + out tiles, double-buffered
        + w_bufs * 2 * 2 * D * tile_h          # bf16 w1 + w2 blocks
        + 2 * 4 * (tile_h + D)                 # f32 bias blocks
        + 4 * tile_m * D                       # f32 accumulator scratch
        + 4 * tile_m * tile_h                  # f32 hidden intermediate
        + 2 * tile_m * tile_h                  # bf16 hidden cast
        + 3 * 4 * tile_m * D                   # misc f32 temps (x_f32, y, ...)
    )
    # Never request (nearly) all of physical VMEM: ~48 MiB cap on 64-MiB v7x,
    # ~96 MiB on 128-MiB v5e/v6e; leave headroom for compiler scratch.
    vmem_ceiling = int(0.75 * vmem_cap)
    vmem_limit = min(vmem_ceiling,
                     max(int(vmem_need * 1.5) + (2 << 20), 32 << 20))

    cost = pl.CostEstimate(
        flops=4 * M * D * H,                   # two matmuls
        transcendentals=M * H,                 # tanh/erf inside the GELU
        bytes_accessed=(2 * M * D * x_itemsize                     # x + out
                        + (1 if resident_params else n_m) * 2 * 2 * D * H
                        + 4 * (H + D)),
    )

    kernel = functools.partial(_residual_ff_kernel,
                               approximate_gelu=not exact_gelu)

    out = pl.pallas_call(
        kernel,
        out_shape=jax.ShapeDtypeStruct((M, D), x.dtype),
        grid_spec=pltpu.PrefetchScalarGridSpec(
            num_scalar_prefetch=0,
            grid=(n_m, n_h),
            in_specs=in_specs,
            out_specs=out_spec,
            scratch_shapes=[pltpu.VMEM((tile_m, D), jnp.float32)],
        ),
        compiler_params=pltpu.CompilerParams(
            dimension_semantics=("parallel", "arbitrary"),
            vmem_limit_bytes=vmem_limit,
        ),
        cost_estimate=cost,
    )(xf, w1b, b1f, w2b, b2f)

    return out.reshape(B, N, D)


def reference_f32(x, w1, b1, w2, b2):
    xf = x.astype(jnp.float32)
    h = jax.nn.gelu(jnp.einsum("bnd,dh->bnh", xf, w1) + b1[0])
    y = jnp.einsum("bnh,hd->bnd", h, w2) + b2[0]
    return y + xf


def reference_matched(x, w1, b1, w2, b2):
    # Same mixed precision as the kernel: bf16 MXU operands, f32 accumulate.
    xf = x.astype(jnp.float32)
    h = jnp.einsum("bnd,dh->bnh", xf.astype(jnp.bfloat16),
                   w1.astype(jnp.bfloat16),
                   preferred_element_type=jnp.float32) + b1[0]
    h = jax.nn.gelu(h)
    y = jnp.einsum("bnh,hd->bnd", h.astype(jnp.bfloat16),
                   w2.astype(jnp.bfloat16),
                   preferred_element_type=jnp.float32) + b2[0]
    return y + xf


if __name__ == "__main__":
    # Small but lane-/MXU-aligned shapes (D, H multiples of 128).  B*N = 18 is
    # deliberately not a multiple of the row tile, exercising the masked-tail
    # path.  Real ViT dims (384 / 768 / 3072 ...) are already aligned.
    B, N, D, H = 2, 9, 128, 256
    key = jax.random.PRNGKey(0)
    k_x, k_w1, k_b1, k_w2, k_b2 = jax.random.split(key, 5)

    x = jax.random.normal(k_x, (B, N, D), dtype=jnp.float32)
    # Deterministic synthetic parameters (no checkpoint load).
    w1 = jax.random.normal(k_w1, (D, H), dtype=jnp.float32) * 0.05
    b1 = jax.random.normal(k_b1, (1, H), dtype=jnp.float32) * 0.01
    w2 = jax.random.normal(k_w2, (H, D), dtype=jnp.float32) * 0.05
    b2 = jax.random.normal(k_b2, (1, D), dtype=jnp.float32) * 0.01

    ref_m = reference_matched(x, w1, b1, w2, b2)
    ref32 = reference_f32(x, w1, b1, w2, b2)

    # 1) Default path: resident weights, single hidden step, masked row tail.
    fused = jax.jit(residual_feedforward)
    out = jax.block_until_ready(fused(x, w1, b1, w2, b2))
    assert out.shape == x.shape and out.dtype == x.dtype
    assert jnp.allclose(out, ref_m, atol=5e-3, rtol=5e-3), \
        "mismatch vs matched-precision reference (resident path)"
    assert jnp.allclose(out, ref32, atol=3e-2, rtol=3e-2), \
        "mismatch vs f32 reference (resident path)"

    # 2) Hidden-dim-split path (trailing 'arbitrary' axis + f32 accumulator),
    #    as used for ViT-L/H sized hidden dims on v7x's 64 MiB VMEM.
    fused_split = jax.jit(functools.partial(residual_feedforward,
                                            tile_rows=8, tile_hidden=128))
    out_split = jax.block_until_ready(fused_split(x, w1, b1, w2, b2))
    assert jnp.allclose(out_split, ref_m, atol=5e-3, rtol=5e-3), \
        "mismatch vs matched-precision reference (hidden-split path)"

    # 3) bf16 activations: streamed HBM traffic halves; residual stays in f32.
    xb = x.astype(jnp.bfloat16)
    out_bf16 = jax.block_until_ready(fused(xb, w1, b1, w2, b2))
    assert out_bf16.shape == x.shape and out_bf16.dtype == jnp.bfloat16
    assert jnp.allclose(out_bf16.astype(jnp.float32), ref32,
                        atol=1e-1, rtol=1e-1), \
        "mismatch vs f32 reference (bf16 activation path)"

    print("KERNEL_OK")
</pallas_src>

<mosaic_0001>
module attributes {stable_mosaic.version = 11 : i64} {
  func.func @_residual_ff_kernel(%arg0: i32, %arg1: i32, %arg2: memref<16x128xf32, #tpu.memory_space<vmem>>, %arg3: memref<128x256xbf16, #tpu.memory_space<vmem>>, %arg4: memref<1x256xf32, #tpu.memory_space<vmem>>, %arg5: memref<256x128xbf16, #tpu.memory_space<vmem>>, %arg6: memref<1x128xf32, #tpu.memory_space<vmem>>, %arg7: memref<16x128xf32, #tpu.memory_space<vmem>>, %arg8: memref<16x128xf32, #tpu.memory_space<vmem>>) attributes {dimension_semantics = [#tpu.dimension_semantics<parallel>, #tpu.dimension_semantics<arbitrary>], iteration_bounds = array<i64: 2, 1>, scalar_prefetch = 0 : i64, scratch_operands = 1 : i64, tpu.core_type = #tpu.core_type<tc>, window_params = [{transform_indices = @transform_0, window_bounds = array<i64: 16, 128>}, {pipeline_mode = #tpu.pipeline_mode<synchronous>, transform_indices = @transform_1, window_bounds = array<i64: 128, 256>}, {pipeline_mode = #tpu.pipeline_mode<synchronous>, transform_indices = @transform_2, window_bounds = array<i64: 1, 256>}, {pipeline_mode = #tpu.pipeline_mode<synchronous>, transform_indices = @transform_3, window_bounds = array<i64: 256, 128>}, {pipeline_mode = #tpu.pipeline_mode<synchronous>, transform_indices = @transform_4, window_bounds = array<i64: 1, 128>}, {transform_indices = @transform_5, window_bounds = array<i64: 16, 128>}]} {
    %c0 = arith.constant 0 : index
    %c0_0 = arith.constant 0 : index
    %0 = vector.load %arg2[%c0, %c0_0] : memref<16x128xf32, #tpu.memory_space<vmem>>, vector<16x128xf32>
    %1 = arith.truncf %0 : vector<16x128xf32> to vector<16x128xbf16>
    %c0_1 = arith.constant 0 : index
    %c0_2 = arith.constant 0 : index
    %2 = vector.load %arg3[%c0_1, %c0_2] : memref<128x256xbf16, #tpu.memory_space<vmem>>, vector<128x256xbf16>
    %cst = arith.constant dense<0.000000e+00> : vector<16x256xf32>
    %3 = tpu.matmul %1, %2, %cst {dimension_numbers = #tpu.dot_dimension_numbers<[1], [0], [0], [1], [0, 0, 1, 1], [], []>} : vector<16x128xbf16>, vector<128x256xbf16>, vector<16x256xf32> -> vector<16x256xf32>
    %c0_3 = arith.constant 0 : index
    %c0_4 = arith.constant 0 : index
    %4 = vector.load %arg4[%c0_3, %c0_4] : memref<1x256xf32, #tpu.memory_space<vmem>>, vector<1x256xf32>
    %5 = vector.broadcast %4 : vector<1x256xf32> to vector<16x256xf32>
    %6 = arith.addf %3, %5 : vector<16x256xf32>
    %7 = arith.mulf %6, %6 : vector<16x256xf32>
    %8 = arith.mulf %6, %7 : vector<16x256xf32>
    %cst_5 = arith.constant 4.471500e-02 : f32
    %9 = vector.broadcast %cst_5 : f32 to vector<16x256xf32>
    %10 = arith.mulf %9, %8 : vector<16x256xf32>
    %11 = arith.addf %6, %10 : vector<16x256xf32>
    %cst_6 = arith.constant 0.797884583 : f32
    %12 = vector.broadcast %cst_6 : f32 to vector<16x256xf32>
    %13 = arith.mulf %12, %11 : vector<16x256xf32>
    %14 = math.tanh %13 : vector<16x256xf32>
    %cst_7 = arith.constant 1.000000e+00 : f32
    %15 = vector.broadcast %cst_7 : f32 to vector<16x256xf32>
    %16 = arith.addf %15, %14 : vector<16x256xf32>
    %cst_8 = arith.constant 5.000000e-01 : f32
    %17 = vector.broadcast %cst_8 : f32 to vector<16x256xf32>
    %18 = arith.mulf %17, %16 : vector<16x256xf32>
    %19 = arith.mulf %6, %18 : vector<16x256xf32>
    %20 = arith.truncf %19 : vector<16x256xf32> to vector<16x256xbf16>
    %c0_9 = arith.constant 0 : index
    %c0_10 = arith.constant 0 : index
    %21 = vector.load %arg5[%c0_9, %c0_10] : memref<256x128xbf16, #tpu.memory_space<vmem>>, vector<256x128xbf16>
    %cst_11 = arith.constant dense<0.000000e+00> : vector<16x128xf32>
    %22 = tpu.matmul %20, %21, %cst_11 {dimension_numbers = #tpu.dot_dimension_numbers<[1], [0], [0], [1], [0, 0, 1, 1], [], []>} : vector<16x256xbf16>, vector<256x128xbf16>, vector<16x128xf32> -> vector<16x128xf32>
    %c0_i32 = arith.constant 0 : i32
    %23 = arith.cmpi eq, %arg1, %c0_i32 : i32
    %24 = arith.extui %23 : i1 to i32
    %c0_i32_12 = arith.constant 0 : i32
    %25 = arith.cmpi ne, %24, %c0_i32_12 : i32
    scf.if %25 {
      %c0_19 = arith.constant 0 : index
      %c0_20 = arith.constant 0 : index
      %32 = vector.load %arg6[%c0_19, %c0_20] : memref<1x128xf32, #tpu.memory_space<vmem>>, vector<1x128xf32>
      %33 = vector.broadcast %32 : vector<1x128xf32> to vector<16x128xf32>
      %34 = arith.addf %0, %33 : vector<16x128xf32>
      %c0_21 = arith.constant 0 : index
      %c0_22 = arith.constant 0 : index
      %35 = vector.load %arg8[%c0_21, %c0_22] : memref<16x128xf32, #tpu.memory_space<vmem>>, vector<16x128xf32>
      tpu.vector_store %arg8[%c0_21, %c0_22], %34 {strides = array<i32>} : memref<16x128xf32, #tpu.memory_space<vmem>>, vector<16x128xf32>,
    } else {
    }
    %c0_13 = arith.constant 0 : index
    %c0_14 = arith.constant 0 : index
    %26 = vector.load %arg8[%c0_13, %c0_14] : memref<16x128xf32, #tpu.memory_space<vmem>>, vector<16x128xf32>
    %27 = arith.addf %26, %22 : vector<16x128xf32>
    %c0_15 = arith.constant 0 : index
    %c0_16 = arith.constant 0 : index
    %28 = vector.load %arg8[%c0_15, %c0_16] : memref<16x128xf32, #tpu.memory_space<vmem>>, vector<16x128xf32>
    tpu.vector_store %arg8[%c0_15, %c0_16], %27 {strides = array<i32>} : memref<16x128xf32, #tpu.memory_space<vmem>>, vector<16x128xf32>,
    %c0_i32_17 = arith.constant 0 : i32
    %29 = arith.cmpi eq, %arg1, %c0_i32_17 : i32
    %30 = arith.extui %29 : i1 to i32
    %c0_i32_18 = arith.constant 0 : i32
    %31 = arith.cmpi ne, %30, %c0_i32_18 : i32
    scf.if %31 {
      %c0_19 = arith.constant 0 : index
      %c0_20 = arith.constant 0 : index
      %32 = vector.load %arg8[%c0_19, %c0_20] : memref<16x128xf32, #tpu.memory_space<vmem>>, vector<16x128xf32>
      %c0_21 = arith.constant 0 : index
      %c0_22 = arith.constant 0 : index
      %33 = vector.load %arg7[%c0_21, %c0_22] : memref<16x128xf32, #tpu.memory_space<vmem>>, vector<16x128xf32>
      tpu.vector_store %arg7[%c0_21, %c0_22], %32 {strides = array<i32>} : memref<16x128xf32, #tpu.memory_space<vmem>>, vector<16x128xf32>,
    } else {
    }
    return
  }
  func.func @transform_0(%arg0: i32, %arg1: i32) -> (i32, i32) {
    %c0_i32 = arith.constant 0 : i32
    %c0_i32_0 = arith.constant 0 : i32
    return %arg0, %c0_i32 : i32, i32
  }
  func.func @transform_1(%arg0: i32, %arg1: i32) -> (i32, i32) {
    %c0_i32 = arith.constant 0 : i32
    %c0_i32_0 = arith.constant 0 : i32
    return %c0_i32, %arg1 : i32, i32
  }
  func.func @transform_2(%arg0: i32, %arg1: i32) -> (i32, i32) {
    %c0_i32 = arith.constant 0 : i32
    %c0_i32_0 = arith.constant 0 : i32
    return %c0_i32, %arg1 : i32, i32
  }
  func.func @transform_3(%arg0: i32, %arg1: i32) -> (i32, i32) {
    %c0_i32 = arith.constant 0 : i32
    %c0_i32_0 = arith.constant 0 : i32
    return %arg1, %c0_i32 : i32, i32
  }
  func.func @transform_4(%arg0: i32, %arg1: i32) -> (i32, i32) {
    %c0_i32 = arith.constant 0 : i32
    %c0_i32_0 = arith.constant 0 : i32
    %c0_i32_1 = arith.constant 0 : i32
    return %c0_i32, %c0_i32_0 : i32, i32
  }
  func.func @transform_5(%arg0: i32, %arg1: i32) -> (i32, i32) {
    %c0_i32 = arith.constant 0 : i32
    %c0_i32_0 = arith.constant 0 : i32
    return %arg0, %c0_i32 : i32, i32
  }
}

</mosaic_0001>

<bundles_post_ra>
// kernel: residual_feedforward.1
= control target key start
LH: loop header
LB: loop body
LE: loop exit
PB: predicated region body
PF: predicated region fallthrough
CT: control target
= control target key end

     0   :  { %s1355_s18 = smov 0   ;;  %s1357_s19 = smov 0   ;;  %s1567_s0 = inlined_call_operand.vmem [shape: f32[18,128], index: 0, kind: input, shape index: {}]   ;;  %s1568_s1 = inlined_call_operand.vmem [shape: bf16[128,256], index: 1, kind: input, shape index: {}]   ;;  %s1569_s2 = inlined_call_operand.vmem [shape: f32[1,256], index: 2, kind: input, shape index: {}]   ;;  %s1570_s3 = inlined_call_operand.vmem [shape: bf16[256,128], index: 3, kind: input, shape index: {}]   ;;  %s1571_s4 = inlined_call_operand.vmem [shape: f32[1,128], index: 4, kind: input, shape index: {}]   ;;  %s1572_s5 = inlined_call_operand.vmem [shape: f32[18,128], index: 5, kind: output, shape index: {}]  }
   0x1   :  { %s1359_s20 = smov 0   ;;  %s1361_s21 = smov 0  }
   0x2   :  { %s1363_s22 = smov 0  }
   0x3 LB: > { %s981_s23 = sadd.s32 4294967295, %s1290_s22   ;;  %s27_s24 = sadd.s32 1, %s1286_s21  ;;  %s1290_s22 = sphi %s1363_s22, %s15_s22   ;;  %s1286_s21 = sphi %s1361_s21, %s1577_s21   ;;  %s1282_s20 = sphi %s1359_s20, %s1576_s20   ;;  %s1278_s19 = sphi %s1357_s19, %s1575_s19   ;;  %s1274_s18 = sphi %s1355_s18, %s1574_s18  }
   0x4   : > { %p29_p0 = scmp.ge.s32.totalorder %s27_s24, 2  ;;  %s159_s25 = sadd.s32 1, %s1278_s19 }
   0x5   : > { %p169_p1 = scmp.ne.s32.totalorder %s1278_s19, %s1274_s18  ;;  %p170_p2 = scmp.eq.s32.totalorder %s981_s23, 1 }
   0x6   : > { %s1579_s24 = smov (%p29_p0, %s27_s24), 0  ;;  %p988_p4 = scmp.ge.s32.totalorder %s1290_s22, 1 }
   0x7   : > { %p1387_p3 = por %p170_p2, %p169_p1  ;;  %s156_s27 = ssub.s32 %s1286_s21, %s1579_s24 }
   0x8   : > { %p240_p5 = scmp.lt.s32.totalorder %s1290_s22, 3  ;;  %p157_p6 = scmp.eq.s32.totalorder %s156_s27, 0 }
   0xa   : > { %p241_p7 = pnand %p988_p4, %p240_p5 }
   0xb   : > { %s1396_s28 = scalar_select %p157_p6, %s1278_s19, %s159_s25  }
   0xc   : > { %244 = sbr.rel (%p241_p7) target bundleno = 527 (0x20f), region = 40  ;;  %s1402_s6 = sshll.u32 (!%p241_p7), %s1282_s20, 1 }
   0xd   : > { %p290_p8 = scmp.lt.s32.totalorder (!%p241_p7), %s1402_s6, 2 }
  0x11   : > { %v1172_v0 = vld [vmem:[%s1568_s1 + $0x74] ss:$8 sps:$4 sm:$0xff]   ;;  %v1174_v1 = vld [vmem:[%s1568_s1 + $0x70] ss:$8 sps:$4 sm:$0xff]   ;;  %v1324_v2 = vmov 0   ;;  %s291_s17 = scalar_select %p290_p8, %s1402_s6, 2  ;;  %v343_v36 = vlaneseq }
  0x12   : > { %465 = vmatprep.mubr.bf16.mxu0 %v1324_v2  ;;  %433 = vmatprep.subr.bf16.mxu0 %v1172_v0  ;;  %v1175_v3 = vld [vmem:[%s1568_s1 + $0x64] ss:$8 sps:$4 sm:$0xff]   ;;  %v1177_v4 = vld [vmem:[%s1568_s1 + $0x60] ss:$8 sps:$4 sm:$0xff]   ;;  %v1178_v5 = vld [vmem:[%s1568_s1 + $0x54] ss:$8 sps:$4 sm:$0xff]  }
  0x13   : > { %434 = vmatpush1.bf16.msra.mxu0 %v1174_v1  ;;  %v1180_v6 = vld [vmem:[%s1568_s1 + $0x50] ss:$8 sps:$4 sm:$0xff]   ;;  %v1181_v7 = vld [vmem:[%s1568_s1 + $0x44] ss:$8 sps:$4 sm:$0xff]   ;;  %v1183_v8 = vld [vmem:[%s1568_s1 + $0x40] ss:$8 sps:$4 sm:$0xff]  }
  0x14   : > { %435 = vmatprep.subr.bf16.mxu0 %v1175_v3  ;;  %v1184_v9 = vld [vmem:[%s1568_s1 + $0x34] ss:$8 sps:$4 sm:$0xff]   ;;  %s991_s8 = sshll.u32 %s291_s17, 3  ;;  %v1186_v10 = vld [vmem:[%s1568_s1 + $0x30] ss:$8 sps:$4 sm:$0xff]   ;;  %v1200_v24 = vld [vmem:[%s1570_s3 + $0x68] sm:$0xff]  }
  0x15   : > { %v1187_v11 = vld [vmem:[%s1568_s1 + $0x24] ss:$8 sps:$4 sm:$0xff]   ;;  %v1189_v12 = vld [vmem:[%s1568_s1 + $0x20] ss:$8 sps:$4 sm:$0xff]   ;;  %v1190_v13 = vld [vmem:[%s1568_s1 + $0x14] ss:$8 sps:$4 sm:$0xff]   ;;  %s293_s7 = scalar_lea.vmem %s1567_s0, %s991_s8 }
  0x16   : > { %v1192_v14 = vld [vmem:[%s1568_s1 + $0x10] ss:$8 sps:$4 sm:$0xff]   ;;  %v1193_v15 = vld [vmem:[%s1568_s1 + $0x4] ss:$8 sps:$4 sm:$0xff]   ;;  %v1195_v16 = vld [vmem:[%s1568_s1] ss:$8 sps:$4 sm:$0xff]  }
  0x17   : > { %436 = vmatpush1.bf16.msra.mxu0 %v1177_v4  ;;  %v1454_v17 = vld [vmem:[%s293_s7] sm:$0xff]  ;;  %v1456_v18 = vld [vmem:[%s293_s7 + $0x8] sm:$0xff]  ;;  %v1196_v20 = vld [vmem:[%s1570_s3 + $0x78] sm:$0xff]   ;;  %v344_v37 = vshrl.u32 %v343_v36, 7  ;;  %s282_s8 = sand.u32 1, %s1274_s18   ;;  %s719_s18 = ssub.s32 (%p1387_p3), 3, %s1402_s6 }
  0x18   : > { %437 = vmatprep.subr.bf16.mxu0 %v1178_v5  ;;  %v324_v19 = vpack.c.bf16 %v1456_v18, %v1454_v17  ;;  %v1197_v21 = vld [vmem:[%s1570_s3 + $0x38] sm:$0xff]   ;;  %1045 = vmatprep.subr.bf16.mxu1 %v1196_v20  ;;  %v1198_v22 = vld [vmem:[%s1570_s3 + $0x70] sm:$0xff]   ;;  %v1201_v25 = vld [vmem:[%s1570_s3 + $0x28] sm:$0xff]   ;;  %s989_s15 = sshll.u32 %s282_s8, 4  ;;  %s1042_s17 = sshll.u32 (%p1387_p3), %s1282_s20, 4 }
  0x19   : > { %1046 = vmatpush3.bf16.msra.mxu1 %v1197_v21  ;;  %v1199_v23 = vld [vmem:[%s1570_s3 + $0x30] sm:$0xff]   ;;  %v1202_v26 = vld [vmem:[%s1570_s3 + $0x60] sm:$0xff]   ;;  %v1204_v28 = vld [vmem:[%s1570_s3 + $0x58] sm:$0xff]   ;;  %v345_v38 = vsub.s32 0, %v344_v37  ;;  %v349_v40 = vsub.s32 1, %v344_v37  ;;  %s1517_s16 = scalar_lea.vmem [#allocation3], %s989_s15   ;;  %s1528_s27 = scalar_lea.vmem (%p1387_p3), %s1572_s5, %s1042_s17  }
  0x1a   : > { %1047 = vmatprep.subr.bf16.mxu1 %v1198_v22  ;;  %v1203_v27 = vld [vmem:[%s1570_s3 + $0x20] sm:$0xff]   ;;  %v1205_v29 = vld [vmem:[%s1570_s3 + $0x18] sm:$0xff]   ;;  %v1206_v30 = vld [vmem:[%s1570_s3 + $0x50] sm:$0xff]   ;;  %p720_p9 = scmp.lt.s32.totalorder (%p1387_p3), %s719_s18, 2 }
  0x1b   : > { %438 = vmatpush1.bf16.msra.mxu0 %v1180_v6  ;;  %v1207_v31 = vld [vmem:[%s1570_s3 + $0x10] sm:$0xff]   ;;  %v1208_v32 = vld [vmem:[%s1570_s3 + $0x48] sm:$0xff]   ;;  %v1210_v34 = vld [vmem:[%s1570_s3 + $0x40] sm:$0xff]  }
  0x1c   : > { %439 = vmatprep.subr.bf16.mxu0 %v1181_v7  ;;  %v1209_v33 = vld [vmem:[%s1570_s3 + $0x8] sm:$0xff]   ;;  %v1211_v35 = vld [vmem:[%s1570_s3] sm:$0xff]  }
  0x1d   : > { %1048 = vmatpush3.bf16.msra.mxu1 %v1199_v23  ;;  %v341_v39 = vld [vmem:[%s1569_s2] sm:$0x3] }
  0x1e   : > { %1049 = vmatprep.subr.bf16.mxu1 %v1200_v24  ;;  %v346_v41 = vrot.slane %v341_v39, %v345_v38  ;;  %v350_v42 = vrot.slane %v341_v39, %v349_v40 }
  0x1f   : > { %440 = vmatpush1.bf16.msra.mxu0 %v1183_v8 }
  0x20   : > { %441 = vmatprep.subr.bf16.mxu0 %v1184_v9 }
  0x21   : > { %1050 = vmatpush3.bf16.msra.mxu1 %v1201_v25 }
  0x22   : > { %1051 = vmatprep.subr.bf16.mxu1 %v1202_v26 }
  0x23   : > { %442 = vmatpush1.bf16.msra.mxu0 %v1186_v10 }
  0x24   : > { %443 = vmatprep.subr.bf16.mxu0 %v1187_v11 }
  0x25   : > { %1052 = vmatpush3.bf16.msra.mxu1 %v1203_v27  ;;  %v1024_v27 = vld [vmem:[%s1571_s4] ss:$0 sm:$0xff] }
  0x26   : > { %1053 = vmatprep.subr.bf16.mxu1 %v1204_v28 }
  0x27   : > { %444 = vmatpush1.bf16.msra.mxu0 %v1189_v12 }
  0x28   : > { %445 = vmatprep.subr.bf16.mxu0 %v1190_v13 }
  0x29   : > { %1054 = vmatpush3.bf16.msra.mxu1 %v1205_v29  ;;  %v694_v29 = vadd.f32 %v1024_v27, %v1454_v17 }
  0x2a   : > { %1055 = vmatprep.subr.bf16.mxu1 %v1206_v30 }
  0x2b   : > { %446 = vmatpush1.bf16.msra.mxu0 %v1192_v14 }
  0x2c   : > { %447 = vmatprep.subr.bf16.mxu0 %v1193_v15 }
  0x2d   : > { %1056 = vmatpush3.bf16.msra.mxu1 %v1207_v31 }
  0x2e   : > { %1057 = vmatprep.subr.bf16.mxu1 %v1208_v32 }
  0x2f   : > { %448 = vmatpush1.bf16.msra.mxu0 %v1195_v16 }
  0x31   : > { %1058 = vmatpush3.bf16.msra.mxu1 %v1209_v33 }
  0x32   : > { %466 = vmatmul.mubr.bf16.vlgmr.msra.gmra.mxu0 %v324_v19  ;;  %1059 = vmatprep.subr.bf16.mxu1 %v1210_v34  ;;  %v695_v34 = vadd.f32 %v1024_v27, %v1456_v18 }
  0x35   : > { %1060 = vmatpush3.bf16.msra.mxu1 %v1211_v35 }
  0xf2   : > { %v467_v43 = vpop.f32.mrf.mxu0 }
  0xf3   : > { %v468_v44 = vadd.f32 %v467_v43, %v346_v41 }
  0xf4   : > { %v469_v45 = vpop.f32.mrf.mxu0 }
  0xf5   : > { %v476_v46 = vmul.f32 %v468_v44, %v468_v44  ;;  %v470_v47 = vadd.f32 %v469_v45, %v350_v42 }
  0xf6   : > { %v471_v48 = vpop.f32.mrf.mxu0 }
  0xf7   : > { %v480_v49 = vmul.f32 %v476_v46, %v468_v44  ;;  %v477_v50 = vmul.f32 %v470_v47, %v470_v47  ;;  %v472_v51 = vadd.f32 %v471_v48, %v346_v41 }
  0xf8   : > { %v473_v52 = vpop.f32.mrf.mxu0 }
  0xf9   : > { %v484_v53 = vmul.f32 0.044715, %v480_v49  ;;  %v481_v54 = vmul.f32 %v477_v50, %v470_v47  ;;  %v478_v55 = vmul.f32 %v472_v51, %v472_v51  ;;  %v474_v56 = vadd.f32 %v473_v52, %v350_v42 }
  0xfb   : > { %v488_v57 = vadd.f32 %v484_v53, %v468_v44  ;;  %v485_v58 = vmul.f32 0.044715, %v481_v54  ;;  %v482_v59 = vmul.f32 %v478_v55, %v472_v51  ;;  %v479_v60 = vmul.f32 %v474_v56, %v474_v56 }
  0xfd   : > { %v492_v61 = vmul.f32 0.7978846, %v488_v57  ;;  %v489_v62 = vadd.f32 %v485_v58, %v470_v47  ;;  %v486_v63 = vmul.f32 0.044715, %v482_v59  ;;  %v483_v0 = vmul.f32 %v479_v60, %v474_v56 }
  0xff   : > { %v490_v1 = vadd.f32 %v486_v63, %v472_v51  ;;  %v487_v2 = vmul.f32 0.044715, %v483_v0  ;;  %v493_v3 = vmul.f32 0.7978846, %v489_v62  ;;  %1212 = vtanh.f32 %v492_v61 }
 0x101   : > { %v494_v4 = vmul.f32 0.7978846, %v490_v1  ;;  %v491_v5 = vadd.f32 %v487_v2, %v474_v56  ;;  %1214 = vtanh.f32 %v493_v3 }
 0x103   : > { %1216 = vtanh.f32 %v494_v4  ;;  %v495_v6 = vmul.f32 0.7978846, %v491_v5 }
 0x105   : > { %1218 = vtanh.f32 %v495_v6 }
 0x10c   : > { %v1213_v7 = vpop.eup %1212 }
 0x10d   : > { %v500_v11 = vadd.f32 1.0, %v1213_v7 }
 0x10e   : > { %v1215_v8 = vpop.eup %1214 }
 0x10f   : > { %v501_v9 = vadd.f32 1.0, %v1215_v8  ;;  %v504_v19 = vmul.f32 0.5, %v500_v11 }
 0x110   : > { %v1217_v10 = vpop.eup %1216 }
 0x111   : > { %v502_v12 = vadd.f32 1.0, %v1217_v10  ;;  %v505_v15 = vmul.f32 0.5, %v501_v9  ;;  %v508_v24 = vmul.f32 %v504_v19, %v468_v44 }
 0x112   : > { %v1219_v13 = vpop.eup %1218 }
 0x113   : > { %v503_v14 = vadd.f32 1.0, %v1219_v13  ;;  %v506_v16 = vmul.f32 0.5, %v502_v12  ;;  %v509_v22 = vmul.f32 %v505_v15, %v470_v47 }
 0x115   : > { %v507_v20 = vmul.f32 0.5, %v503_v14  ;;  %v510_v21 = vmul.f32 %v506_v16, %v472_v51 }
 0x117   : > { %v511_v23 = vmul.f32 %v507_v20, %v474_v56  ;;  %v512_v26 = vpack.c.bf16 %v510_v21, %v508_v24 }
 0x119   : > { %v513_v25 = vpack.c.bf16 %v511_v23, %v509_v22 }
 0x11b   : > { %674 = vmatprep.mubr.bf16.mxu1 %v513_v25 }
 0x11c   : > { %675 = vmatmul.mubr.bf16.vlgmr.msra.gmra.mxu1 %v512_v26 }
 0x1dc   : > { %v1061_v28 = vpop.f32.mrf.mxu1 }
 0x1de   : > { %v1062_v30 = vpop.f32.mrf.mxu1 }
 0x1df   : > { %v1063_v31 = vadd.f32 %v1062_v30, %v1061_v28 }
 0x1e0   : > { %v1064_v32 = vpop.f32.mrf.mxu1 }
 0x1e1   : > { %v700_v33 = vadd.f32 %v1063_v31, %v694_v29 }
 0x1e2   : > { %v1065_v35 = vpop.f32.mrf.mxu1 }
 0x1e3   : > { %709 = vst [vmem:[%s1517_s16] sm:$0xff] %v700_v33  ;;  %v1066_v36 = vadd.f32 %v1065_v35, %v1064_v32  ;;  %717 = sbr.rel (!%p1387_p3) target bundleno = 527 (0x20f), region = 52 }
 0x1e5   : > { %v701_v37 = vadd.f32 %v1066_v36, %v695_v34 }
 0x1e7   : > { %710 = vst [vmem:[%s1517_s16 + $0x8] sm:$0xff] %v701_v37 }
 0x1e8   : > { %s1581_s18 = smov (!%p720_p9, %s719_s18), 2 }
 0x1e9   : > { %s1027_s29 = sshll.u32 %s1581_s18, 7 }
 0x1ea   : > { %p1030_p10 = scmp.eq.s32.totalorder %s1027_s29, 0 }
 0x1eb   : > { %s1534_s30 = sshrl.u32 (!%p1030_p10), %s1581_s18, 1 }
 0x1ec   : > { %728 = sbr.rel (%p1030_p10) target bundleno = 527 (0x20f), region = 56  ;;  %p1031_p11 = scmp.le.s32.totalorder (!%p1030_p10), %s1534_s30, 0 }
 0x1f1   : > { %902 = sbr.rel (%p1031_p11) target bundleno = 510 (0x1fe), region = 141  ;;  %s1292_s20 = smov (!%p1031_p11), %s1528_s27  }
 0x1f2   : > { %s1296_s26 = smov (!%p1031_p11), %s1517_s16   ;;  %s1300_s6 = smov (!%p1031_p11), 0  }
 0x1f3   : > { %s1304_s7 = smov (!%p1031_p11), 0  }
 0x1f6 LB: >> { %v793_v17 = vld [vmem:[%s1298_s26] sm:$0xff]  ;;  %v795_v18 = vld [vmem:[%s1298_s26 + $0x8] sm:$0xff]  ;;  %s797_s9 = sadd.s32 1, %s1302_s6  ;;  %s787_s7 = sadd.s32 1, %s1306_s7   ;;  %s1306_s7 = sphi %s1304_s7, %s787_s7   ;;  %s1302_s6 = sphi %s1300_s6, %s1301_s6   ;;  %s1298_s26 = sphi %s1296_s26, %s802_s26   ;;  %s1294_s20 = sphi %s1292_s20, %s803_s20  }
 0x1f7   : >> { %794 = vst [vmem:[%s1294_s20] sm:$0xff] %v793_v17  ;;  %796 = vst [vmem:[%s1294_s20 + $0x8] sm:$0xff] %v795_v18  ;;  %p798_p12 = scmp.ge.s32.totalorder %s797_s9, %s1534_s30  ;;  %p786_p13 = scmp.ge.s32.totalorder %s787_s7, %s1534_s30 }
 0x1f9   : >> { %s1583_s9 = smov (%p798_p12, %s797_s9), 0  ;;  %789 = sbr.rel (!%p786_p13) target bundleno = 502 (0x1f6), region = 147 }
 0x1fa   : >> { %s1032_s10 = sshll.u32 %s1583_s9, 4  ;;  %s1301_s6 = smov %s1583_s9  }
 0x1fb   : >> { %s802_s26 = scalar_lea.vmem %s1517_s16, %s1032_s10 [#allocation3]   ;;  %s803_s20 = scalar_lea.vmem %s1528_s27, %s1032_s10  }
 0x1fe PF: > { %s1544_s11 = sand.u32 1, %s1581_s18   ;;  %s1043_s12 = sshll.u32 %s1534_s30, 4 }
 0x1ff   : > { %s808_s8 = scalar_lea.vmem %s1517_s16, %s1043_s12 [#allocation3]   ;;  %s810_s13 = scalar_lea.vmem %s1528_s27, %s1043_s12  }
 0x200   : > { %p1037_p0 = scmp.le.s32.totalorder %s1544_s11, 0 }
 0x201   : > { %s1308_s14 = smov (!%p1037_p0), %s810_s13   ;;  %s1312_s15 = smov (!%p1037_p0), %s808_s8  }
 0x202   : > { %916 = sbr.rel (%p1037_p0) target bundleno = 527 (0x20f), region = 152  ;;  %s1316_s17 = smov (!%p1037_p0), 0  }
 0x203   : > { %s1320_s23 = smov (!%p1037_p0), 0  }
 0x207 LB: >> { %v820_v38 = vld [vmem:[%s1314_s15] sm:$0xff]  ;;  %s822_s18 = sadd.s32 1, %s1318_s17  ;;  %s814_s23 = sadd.s32 1, %s1322_s23   ;;  %s1322_s23 = sphi %s1320_s23, %s814_s23   ;;  %s1318_s17 = sphi %s1316_s17, %s1317_s17   ;;  %s1314_s15 = sphi %s1312_s15, %s827_s15   ;;  %s1310_s14 = sphi %s1308_s14, %s828_s14  }
 0x208   : >> { %821 = vst [vmem:[%s1310_s14] sm:$0xff] %v820_v38  ;;  %p823_p1 = scmp.ge.s32.totalorder %s822_s18, %s1544_s11  ;;  %p813_p2 = scmp.ge.s32.totalorder %s814_s23, %s1544_s11 }
 0x20a   : >> { %s1585_s18 = smov (%p823_p1, %s822_s18), 0  ;;  %816 = sbr.rel (!%p813_p2) target bundleno = 519 (0x207), region = 158 }
 0x20b   : >> { %s1038_s16 = sshll.u32 %s1585_s18, 3  ;;  %s1317_s17 = smov %s1585_s18  }
 0x20c   : >> { %s827_s15 = scalar_lea.vmem %s808_s8, %s1038_s16 [#allocation3]   ;;  %s828_s14 = scalar_lea.vmem %s810_s13, %s1038_s16  }
 0x20f PF: > { %s15_s22 = sadd.s32 1, %s1290_s22   ;;  %s1574_s18 = smov %s1278_s19 }
 0x210   : > { %p12_p3 = scmp.ge.s32.totalorder %s15_s22, 4   ;;  %s1575_s19 = smov %s1396_s28 }
 0x211   : > { %s1576_s20 = smov %s1286_s21  ;;  %s1577_s21 = smov %s1579_s24 }
 0x212   :  { %14 = sbr.rel (!%p12_p3) target bundleno = 3 (0x3), region = 169 }

</bundles_post_ra>
